<compile_context>
chip_gen: v7x
topology: tpu7x:2x2x1
jax: 0.10.0
libtpu: 0.0.40
codegen_flags: <defaults>
</compile_context>

<pallas_src>
import functools

import jax
import jax.numpy as jnp
from jax.experimental import pallas as pl
from jax.experimental.pallas import tpu as pltpu

# Finite "-inf": avoids -inf - (-inf) = NaN inside the online softmax.
_NEG_LARGE = -1e30


def _attental_sum_body(x_ref, w_ref, b_ref, mask_ref, out_ref,
                       m_ref, l_ref, acc_ref, *, rows_tail):
    """One (B_tile, S_tile) grid step of the online-softmax attention sum.

    x_ref    : (st, bt, D) block of x (input dtype)
    w_ref    : (1, 1, D)  f32 Linear weight (resident)
    b_ref    : (1, 1)     f32 Linear bias (SMEM)
    mask_ref : (st, bt, 1) int32 src_mask block (1 == drop) or None
    out_ref  : (bt, D)    output block, written once on the last S step
    m/l/acc  : (bt,1)/(bt,1)/(bt,D) f32 online-softmax state (VMEM scratch)
    rows_tail: number of valid rows in the last S block (== st if S % st == 0)
    """
    sj = pl.program_id(1)
    last = pl.num_programs(1) - 1

    @pl.when(sj == 0)
    def _init():
        m_ref[...] = jnp.full_like(m_ref, _NEG_LARGE)
        l_ref[...] = jnp.zeros_like(l_ref)
        acc_ref[...] = jnp.zeros_like(acc_ref)

    w = w_ref[...].astype(jnp.float32)          # (1, 1, D)
    bias = b_ref[0, 0]                          # f32 scalar

    def step(rows):
        # All math in f32 on the VPU; bf16 x is upcast in-register only.
        x = x_ref[pl.ds(0, rows)].astype(jnp.float32)              # (rows, bt, D)

        # logits[s, b] = tanh(sum_d x[s,b,d] * w[d] + bias): VPU mul + lane reduce.
        logits = jnp.tanh(jnp.sum(x * w, axis=-1, keepdims=True) + bias)  # (rows, bt, 1)

        keep = None
        if mask_ref is not None:
            keep = mask_ref[pl.ds(0, rows)] == 0                   # (rows, bt, 1)
            logits = jnp.where(keep, logits, _NEG_LARGE)

        # ---- online softmax over the sequence axis ----
        m_prev = m_ref[...]                                        # (bt, 1)
        m_new = jnp.maximum(m_prev, jnp.max(logits, axis=0))       # (bt, 1)
        alpha = jnp.exp(m_prev - m_new)
        p = jnp.exp(logits - m_new)                                # (rows, bt, 1)
        if keep is not None:
            # exact zeros for dropped positions; also neutralizes fully-masked rows
            p = jnp.where(keep, p, 0.0)
        l_ref[...] = alpha * l_ref[...] + jnp.sum(p, axis=0)
        m_ref[...] = m_new

        # weighted accumulation: sum_s p[s,b] * x[s,b,:]
        # (VPU lane-broadcast multiply + adds over the leading S axis; no MXU).
        acc_ref[...] = alpha * acc_ref[...] + jnp.sum(x * p, axis=0)   # (bt, D)

    n_rows = x_ref.shape[0]
    if rows_tail == n_rows:
        # S % s_tile == 0: every block is full.
        step(n_rows)
    else:
        # Last S block is partial: statically slice to the valid rows so the
        # (uninitialized) padded tail of the block is never touched.
        @pl.when(sj < last)
        def _full_block():
            step(n_rows)

        @pl.when(sj == last)
        def _tail_block():
            step(rows_tail)

    @pl.when(sj == last)
    def _finalize():
        l = l_ref[...]
        # Guard fully-masked rows (reference would give NaN; we emit zeros).
        denom = jnp.where(l > 0.0, l, 1.0)
        out_ref[...] = (acc_ref[...] / denom).astype(out_ref.dtype)


def _kernel_unmasked(x_ref, w_ref, b_ref, out_ref, m_ref, l_ref, acc_ref, *,
                     rows_tail):
    _attental_sum_body(x_ref, w_ref, b_ref, None, out_ref, m_ref, l_ref,
                       acc_ref, rows_tail=rows_tail)


def _kernel_masked(x_ref, w_ref, b_ref, mask_ref, out_ref, m_ref, l_ref,
                   acc_ref, *, rows_tail):
    _attental_sum_body(x_ref, w_ref, b_ref, mask_ref, out_ref, m_ref, l_ref,
                       acc_ref, rows_tail=rows_tail)


def _round_up(value, multiple):
    return (value + multiple - 1) // multiple * multiple


def _cdiv(a, b):
    return (a + b - 1) // b


def _default_vmem_limit():
    """Pick a scoped-VMEM limit from the physical capacity of this chip."""
    cap = None
    try:
        info = pltpu.get_tpu_info()
        cap = getattr(info, "vmem_capacity_bytes", None)
    except Exception:
        cap = None
    if not cap:
        cap = 64 * 1024 * 1024          # conservative fallback (v7x-sized VMEM)
    # v5e/v6e (128 MiB physical) -> 64 MiB; v7x (64 MiB physical) -> 32 MiB.
    return min(cap // 2, 64 * 1024 * 1024)


def attental_sum(x, w, b, src_mask=None, *, s_tile_max=None,
                 vmem_limit_bytes=None):
    """AttentalSum forward.

    Args:
      x:        (S, B, D) array (seq, batch, feature) -- PyTorch layout, kept
                as-is (no wrapper transpose / pad).
      w:        (1, D) Linear(input_dim, 1) weight.
      b:        (1,)   Linear bias.
      src_mask: optional (B, S) bool; True == drop that position from softmax.
      s_tile_max: optional cap on the S tile (mostly for tests).
      vmem_limit_bytes: optional override of the scoped VMEM limit.
    Returns:
      (B, D) weighted sum over the sequence axis.
    """
    S, B, D = x.shape
    # NOTE: D is the lane axis everywhere; it should ideally be a multiple of
    # 128 (Prosit's real D=512 is fine).  We deliberately do NOT pad D here --
    # that would cost a full extra HBM copy of x.

    if vmem_limit_bytes is None:
        vmem_limit_bytes = _default_vmem_limit()

    # ---- batch tile (second-minor dim of every block) ----------------------
    # Full B when small (exempt from the (8,128) rule); otherwise a multiple of
    # 32 chosen so the "parallel" axis has >= 2 tiles (v7x dual TensorCore).
    if B <= 32:
        bt = B
    else:
        bt = min(_round_up(_cdiv(B, 2), 32), 64)
    nb = _cdiv(B, bt)

    # ---- sequence tile (leading dim of the x block) -------------------------
    # Budget: 2 double-buffered x blocks (input dtype) + ~3 tile-sized f32
    # temporaries (x*w, x*p, f32 upcast) materialized by the compiler, plus
    # ~4 MiB slack for out/acc/mask/internal scratch.
    itemsize = jnp.dtype(x.dtype).itemsize
    bytes_per_row = bt * D * (2 * itemsize + 3 * 4)
    budget = max(vmem_limit_bytes - 4 * 1024 * 1024, 1 * 1024 * 1024)
    st = max(8, (budget // bytes_per_row) // 8 * 8)
    if s_tile_max is not None:
        st = max(8, min(st, int(s_tile_max)))
    if st >= S:
        st = S
    ns = _cdiv(S, st)
    rows_tail = S - (ns - 1) * st      # valid rows in the last (possibly partial) block

    # ---- operands ------------------------------------------------------------
    w_row = jnp.reshape(jnp.asarray(w, jnp.float32), (1, 1, D))   # resident block
    bias = jnp.asarray(b, jnp.float32).reshape(1, 1)              # SMEM scalar

    x_spec = pl.BlockSpec((st, bt, D), lambda bi, sj: (sj, bi, 0))
    w_spec = pl.BlockSpec((1, 1, D), lambda bi, sj: (0, 0, 0))
    b_spec = pl.BlockSpec(memory_space=pltpu.SMEM)
    out_spec = pl.BlockSpec((bt, D), lambda bi, sj: (bi, 0))
    scratch_shapes = [
        pltpu.VMEM((bt, 1), jnp.float32),   # running max  m
        pltpu.VMEM((bt, 1), jnp.float32),   # running sum  l
        pltpu.VMEM((bt, D), jnp.float32),   # output accumulator
    ]
    compiler_params = pltpu.CompilerParams(
        dimension_semantics=("parallel", "arbitrary"),
        vmem_limit_bytes=vmem_limit_bytes,
    )
    out_shape = jax.ShapeDtypeStruct((B, D), x.dtype)

    if src_mask is None:
        # No dummy mask DMA in the unmasked case.
        kernel = functools.partial(_kernel_unmasked, rows_tail=rows_tail)
        return pl.pallas_call(
            kernel,
            out_shape=out_shape,
            grid=(nb, ns),
            in_specs=[x_spec, w_spec, b_spec],
            out_specs=out_spec,
            scratch_shapes=scratch_shapes,
            compiler_params=compiler_params,
        )(x, w_row, bias)

    # Mask reshaped to (S, B, 1) so it shares the x tile's natural layout
    # (no in-kernel relayout).  The (B,1)->(8,128) minor-dim tiling pads it to
    # ~4 KiB per sequence position either way, so int32 vs int8 is a wash here.
    mask3 = jnp.transpose(jnp.asarray(src_mask, jnp.int32), (1, 0))[:, :, None]
    mask_spec = pl.BlockSpec((st, bt, 1), lambda bi, sj: (sj, bi, 0))
    kernel = functools.partial(_kernel_masked, rows_tail=rows_tail)
    return pl.pallas_call(
        kernel,
        out_shape=out_shape,
        grid=(nb, ns),
        in_specs=[x_spec, w_spec, b_spec, mask_spec],
        out_specs=out_spec,
        scratch_shapes=scratch_shapes,
        compiler_params=compiler_params,
    )(x, w_row, bias, mask3)


def attental_sum_ref(x, w, b, src_mask=None):
    """Pure-JAX reference mirroring the PyTorch forward (f32 math)."""
    x = x.astype(jnp.float32)
    logits = jnp.tanh(
        jnp.einsum("sbd,d->sb", x, jnp.asarray(w, jnp.float32)[0],
                   precision=jax.lax.Precision.HIGHEST)
        + jnp.asarray(b, jnp.float32)[0])                               # (S, B)
    if src_mask is not None:
        logits = jnp.where(jnp.transpose(src_mask, (1, 0)), -jnp.inf, logits)
    weight = jax.nn.softmax(logits, axis=0)                             # (S, B)
    return jnp.sum(x * weight[:, :, None], axis=0)                      # (B, D)


def _check(out, ref, name, atol, rtol):
    assert out.shape == ref.shape, (name, out.shape, ref.shape)
    out32 = jnp.asarray(out, jnp.float32)
    ref32 = jnp.asarray(ref, jnp.float32)
    err = float(jnp.max(jnp.abs(out32 - ref32)))
    assert jnp.allclose(out32, ref32, atol=atol, rtol=rtol), (name, err)


if __name__ == "__main__":
    key = jax.random.PRNGKey(0)
    kx, kw, kb, k2, km = jax.random.split(key, 5)

    D = 32
    # nn.Linear(input_dim, 1): weight (1, D), bias (1,)
    w = jax.random.normal(kw, (1, D), dtype=jnp.float32) * (1.0 / jnp.sqrt(D))
    b = jax.random.normal(kb, (1,), dtype=jnp.float32) * 0.1

    # 1) Small case: single S tile, no mask.
    S, B = 8, 2
    x = jax.random.normal(kx, (S, B, D), dtype=jnp.float32)
    out = jax.block_until_ready(attental_sum(x, w, b))
    _check(out, attental_sum_ref(x, w, b), "unmasked-small", 1e-3, 1e-3)

    # 2) Multiple S tiles with a partial tail block (200 = 3*64 + 8), no mask.
    S2, B2 = 200, 5
    x2 = jax.random.normal(k2, (S2, B2, D), dtype=jnp.float32)
    out2 = jax.block_until_ready(attental_sum(x2, w, b, s_tile_max=64))
    _check(out2, attental_sum_ref(x2, w, b), "unmasked-tiled", 1e-3, 1e-3)

    # 3) Same, with src_mask.
    src_mask = jax.random.bernoulli(km, 0.4, (B2, S2))
    src_mask = src_mask.at[:, 0].set(False)      # keep >= 1 position per row
    out3 = jax.block_until_ready(
        attental_sum(x2, w, b, src_mask=src_mask, s_tile_max=64))
    _check(out3, attental_sum_ref(x2, w, b, src_mask=src_mask),
           "masked-tiled", 1e-3, 1e-3)

    # 4) bf16 activations stay bf16 through the DMA; math is f32 in-register.
    x2b = x2.astype(jnp.bfloat16)
    out4 = jax.block_until_ready(attental_sum(x2b, w, b, s_tile_max=64))
    _check(out4, attental_sum_ref(x2b, w, b), "unmasked-bf16", 3e-2, 3e-2)

    print("KERNEL_OK")
</pallas_src>

<mosaic_0001>
module attributes {stable_mosaic.version = 11 : i64} {
  func.func @_kernel_unmasked(%arg0: i32, %arg1: i32, %arg2: memref<8x2x32xf32, #tpu.memory_space<vmem>>, %arg3: memref<1x1x32xf32, #tpu.memory_space<vmem>>, %arg4: memref<1x1xf32, #tpu.memory_space<smem>>, %arg5: memref<2x32xf32, #tpu.memory_space<vmem>>, %arg6: memref<2x1xf32, #tpu.memory_space<vmem>>, %arg7: memref<2x1xf32, #tpu.memory_space<vmem>>, %arg8: memref<2x32xf32, #tpu.memory_space<vmem>>) attributes {dimension_semantics = [#tpu.dimension_semantics<parallel>, #tpu.dimension_semantics<arbitrary>], iteration_bounds = array<i64: 1, 1>, scalar_prefetch = 0 : i64, scratch_operands = 3 : i64, tpu.core_type = #tpu.core_type<tc>, window_params = [{transform_indices = @transform_0, window_bounds = array<i64: 8, 2, 32>}, {pipeline_mode = #tpu.pipeline_mode<synchronous>, transform_indices = @transform_1, window_bounds = array<i64: 1, 1, 32>}, {transform_indices = @transform_2, window_bounds = array<i64: 1, 1>}, {transform_indices = @transform_3, window_bounds = array<i64: 2, 32>}]} {
    %c0_i32 = arith.constant 0 : i32
    %0 = arith.cmpi eq, %arg1, %c0_i32 : i32
    %1 = arith.extui %0 : i1 to i32
    %c0_i32_0 = arith.constant 0 : i32
    %2 = arith.cmpi ne, %1, %c0_i32_0 : i32
    scf.if %2 {
      %cst_25 = arith.constant -1.000000e+30 : f32
      %39 = vector.broadcast %cst_25 : f32 to vector<2x1xf32>
      %c0_26 = arith.constant 0 : index
      %c0_27 = arith.constant 0 : index
      %40 = vector.load %arg6[%c0_26, %c0_27] : memref<2x1xf32, #tpu.memory_space<vmem>>, vector<2x1xf32>
      tpu.vector_store %arg6[%c0_26, %c0_27], %39 {strides = array<i32>} : memref<2x1xf32, #tpu.memory_space<vmem>>, vector<2x1xf32>,
      %cst_28 = arith.constant 0.000000e+00 : f32
      %41 = vector.broadcast %cst_28 : f32 to vector<2x1xf32>
      %c0_29 = arith.constant 0 : index
      %c0_30 = arith.constant 0 : index
      %42 = vector.load %arg7[%c0_29, %c0_30] : memref<2x1xf32, #tpu.memory_space<vmem>>, vector<2x1xf32>
      tpu.vector_store %arg7[%c0_29, %c0_30], %41 {strides = array<i32>} : memref<2x1xf32, #tpu.memory_space<vmem>>, vector<2x1xf32>,
      %cst_31 = arith.constant 0.000000e+00 : f32
      %43 = vector.broadcast %cst_31 : f32 to vector<2x32xf32>
      %c0_32 = arith.constant 0 : index
      %c0_33 = arith.constant 0 : index
      %44 = vector.load %arg8[%c0_32, %c0_33] : memref<2x32xf32, #tpu.memory_space<vmem>>, vector<2x32xf32>
      tpu.vector_store %arg8[%c0_32, %c0_33], %43 {strides = array<i32>} : memref<2x32xf32, #tpu.memory_space<vmem>>, vector<2x32xf32>,
    } else {
    }
    %c0 = arith.constant 0 : index
    %c0_1 = arith.constant 0 : index
    %c0_2 = arith.constant 0 : index
    %3 = vector.load %arg3[%c0, %c0_1, %c0_2] : memref<1x1x32xf32, #tpu.memory_space<vmem>>, vector<1x1x32xf32>
    %c0_3 = arith.constant 0 : index
    %c0_4 = arith.constant 0 : index
    %4 = memref.load %arg4[%c0_3, %c0_4] : memref<1x1xf32, #tpu.memory_space<smem>>
    %c0_5 = arith.constant 0 : index
    %c0_6 = arith.constant 0 : index
    %c0_7 = arith.constant 0 : index
    %5 = vector.load %arg2[%c0_5, %c0_6, %c0_7] : memref<8x2x32xf32, #tpu.memory_space<vmem>>, vector<8x2x32xf32>
    %6 = vector.broadcast %3 : vector<1x1x32xf32> to vector<8x2x32xf32>
    %7 = arith.mulf %5, %6 : vector<8x2x32xf32>
    %cst = arith.constant dense<0.000000e+00> : vector<8x2xf32>
    %8 = vector.multi_reduction <add>, %7, %cst [2] : vector<8x2x32xf32> to vector<8x2xf32>
    %9 = vector.shape_cast %8 : vector<8x2xf32> to vector<8x2x1xf32>
    %10 = vector.broadcast %4 : f32 to vector<8x2x1xf32>
    %11 = arith.addf %9, %10 : vector<8x2x1xf32>
    %12 = math.tanh %11 : vector<8x2x1xf32>
    %c0_8 = arith.constant 0 : index
    %c0_9 = arith.constant 0 : index
    %13 = vector.load %arg6[%c0_8, %c0_9] : memref<2x1xf32, #tpu.memory_space<vmem>>, vector<2x1xf32>
    %cst_10 = arith.constant dense<0xFF800000> : vector<2x1xf32>
    %14 = vector.multi_reduction <maximumf>, %12, %cst_10 [0] : vector<8x2x1xf32> to vector<2x1xf32>
    %15 = arith.maximumf %13, %14 : vector<2x1xf32>
    %16 = arith.subf %13, %15 : vector<2x1xf32>
    %17 = math.exp %16 : vector<2x1xf32>
    %18 = vector.shape_cast %15 : vector<2x1xf32> to vector<1x2x1xf32>
    %19 = vector.broadcast %18 : vector<1x2x1xf32> to vector<8x2x1xf32>
    %20 = arith.subf %12, %19 : vector<8x2x1xf32>
    %21 = math.exp %20 : vector<8x2x1xf32>
    %c0_11 = arith.constant 0 : index
    %c0_12 = arith.constant 0 : index
    %22 = vector.load %arg7[%c0_11, %c0_12] : memref<2x1xf32, #tpu.memory_space<vmem>>, vector<2x1xf32>
    %23 = arith.mulf %17, %22 : vector<2x1xf32>
    %cst_13 = arith.constant dense<0.000000e+00> : vector<2x1xf32>
    %24 = vector.multi_reduction <add>, %21, %cst_13 [0] : vector<8x2x1xf32> to vector<2x1xf32>
    %25 = arith.addf %23, %24 : vector<2x1xf32>
    %c0_14 = arith.constant 0 : index
    %c0_15 = arith.constant 0 : index
    %26 = vector.load %arg7[%c0_14, %c0_15] : memref<2x1xf32, #tpu.memory_space<vmem>>, vector<2x1xf32>
    tpu.vector_store %arg7[%c0_14, %c0_15], %25 {strides = array<i32>} : memref<2x1xf32, #tpu.memory_space<vmem>>, vector<2x1xf32>,
    %c0_16 = arith.constant 0 : index
    %c0_17 = arith.constant 0 : index
    %27 = vector.load %arg6[%c0_16, %c0_17] : memref<2x1xf32, #tpu.memory_space<vmem>>, vector<2x1xf32>
    tpu.vector_store %arg6[%c0_16, %c0_17], %15 {strides = array<i32>} : memref<2x1xf32, #tpu.memory_space<vmem>>, vector<2x1xf32>,
    %c0_18 = arith.constant 0 : index
    %c0_19 = arith.constant 0 : index
    %28 = vector.load %arg8[%c0_18, %c0_19] : memref<2x32xf32, #tpu.memory_space<vmem>>, vector<2x32xf32>
    %29 = vector.broadcast %17 : vector<2x1xf32> to vector<2x32xf32>
    %30 = arith.mulf %29, %28 : vector<2x32xf32>
    %31 = vector.broadcast %21 : vector<8x2x1xf32> to vector<8x2x32xf32>
    %32 = arith.mulf %5, %31 : vector<8x2x32xf32>
    %cst_20 = arith.constant dense<0.000000e+00> : vector<2x32xf32>
    %33 = vector.multi_reduction <add>, %32, %cst_20 [0] : vector<8x2x32xf32> to vector<2x32xf32>
    %34 = arith.addf %30, %33 : vector<2x32xf32>
    %c0_21 = arith.constant 0 : index
    %c0_22 = arith.constant 0 : index
    %35 = vector.load %arg8[%c0_21, %c0_22] : memref<2x32xf32, #tpu.memory_space<vmem>>, vector<2x32xf32>
    tpu.vector_store %arg8[%c0_21, %c0_22], %34 {strides = array<i32>} : memref<2x32xf32, #tpu.memory_space<vmem>>, vector<2x32xf32>,
    %c0_i32_23 = arith.constant 0 : i32
    %36 = arith.cmpi eq, %arg1, %c0_i32_23 : i32
    %37 = arith.extui %36 : i1 to i32
    %c0_i32_24 = arith.constant 0 : i32
    %38 = arith.cmpi ne, %37, %c0_i32_24 : i32
    scf.if %38 {
      %c0_25 = arith.constant 0 : index
      %c0_26 = arith.constant 0 : index
      %39 = vector.load %arg7[%c0_25, %c0_26] : memref<2x1xf32, #tpu.memory_space<vmem>>, vector<2x1xf32>
      %cst_27 = arith.constant 0.000000e+00 : f32
      %40 = vector.broadcast %cst_27 : f32 to vector<2x1xf32>
      %41 = arith.cmpf ogt, %39, %40 : vector<2x1xf32>
      %cst_28 = arith.constant 1.000000e+00 : f32
      %42 = vector.broadcast %cst_28 : f32 to vector<2x1xf32>
      %43 = arith.select %41, %39, %42 : vector<2x1xi1>, vector<2x1xf32>
      %c0_29 = arith.constant 0 : index
      %c0_30 = arith.constant 0 : index
      %44 = vector.load %arg8[%c0_29, %c0_30] : memref<2x32xf32, #tpu.memory_space<vmem>>, vector<2x32xf32>
      %45 = vector.broadcast %43 : vector<2x1xf32> to vector<2x32xf32>
      %46 = arith.divf %44, %45 : vector<2x32xf32>
      %c0_31 = arith.constant 0 : index
      %c0_32 = arith.constant 0 : index
      %47 = vector.load %arg5[%c0_31, %c0_32] : memref<2x32xf32, #tpu.memory_space<vmem>>, vector<2x32xf32>
      tpu.vector_store %arg5[%c0_31, %c0_32], %46 {strides = array<i32>} : memref<2x32xf32, #tpu.memory_space<vmem>>, vector<2x32xf32>,
    } else {
    }
    return
  }
  func.func @transform_0(%arg0: i32, %arg1: i32) -> (i32, i32, i32) {
    %c0_i32 = arith.constant 0 : i32
    %c0_i32_0 = arith.constant 0 : i32
    return %arg1, %arg0, %c0_i32 : i32, i32, i32
  }
  func.func @transform_1(%arg0: i32, %arg1: i32) -> (i32, i32, i32) {
    %c0_i32 = arith.constant 0 : i32
    %c0_i32_0 = arith.constant 0 : i32
    %c0_i32_1 = arith.constant 0 : i32
    %c0_i32_2 = arith.constant 0 : i32
    return %c0_i32, %c0_i32_0, %c0_i32_1 : i32, i32, i32
  }
  func.func @transform_2(%arg0: i32, %arg1: i32) -> (i32, i32) {
    %c0_i32 = arith.constant 0 : i32
    %c0_i32_0 = arith.constant 0 : i32
    %c0_i32_1 = arith.constant 0 : i32
    return %c0_i32, %c0_i32_0 : i32, i32
  }
  func.func @transform_3(%arg0: i32, %arg1: i32) -> (i32, i32) {
    %c0_i32 = arith.constant 0 : i32
    %c0_i32_0 = arith.constant 0 : i32
    return %arg0, %c0_i32 : i32, i32
  }
}

</mosaic_0001>

<bundles_post_ra>
// kernel: tpu_custom_call.1
= control target key start
LH: loop header
LB: loop body
LE: loop exit
PB: predicated region body
PF: predicated region fallthrough
CT: control target
= control target key end

     0   :  { %9 = vsyncpa [#allocation7], 0  ;;  %s487_s0 = inlined_call_operand.hbm [shape: f32[8,2,32], index: 0, kind: input, shape index: {}]   ;;  %s488_s1 = inlined_call_operand.vmem [shape: f32[1,1,32], index: 1, kind: input, shape index: {}]   ;;  %s489_s2 = inlined_call_operand.<no memory space> [shape: f32[1,1], index: 2, kind: input, shape index: {}]   ;;  %s490_s3 = inlined_call_operand.hbm [shape: f32[2,32], index: 3, kind: output, shape index: {}]  }
   0x1   :  { %10 = vsyncpa [#allocation8], 0  ;;  %s367_s12 = smov [#allocation6]   ;;  %s319_s16 = scalar_lea.hbm %s487_s0, 256 }
   0x2   :  { %s16_s13 = sshll.u32 %s367_s12, 4  ;;  %p320_p0 = scmp.ne.s32.totalorder %s487_s0, %s319_s16  ;;  %s17_s13 = int_to_ptr.vmem [resolvable:$true] %s16_s13 }
   0x3   :  { %p323_p1 = scmp.lt.u32.totalorder %s319_s16, %s487_s0 }
   0x5   :  { %p325_p2 = pnand %p323_p1, %p320_p0 }
   0x7   :  { %328 = shalt.err (!%p325_p2)
}
   0x8   :  { %s329_s21 = scalar_lea.vmem %s17_s13, 256  ;;  %p334_p4 = scmp.lt.s32.totalorder %s17_s13, %s17_s13 }
   0x9   :  { %p330_p3 = scmp.ne.s32.totalorder %s17_s13, %s329_s21  ;;  %p335_p5 = scmp.lt.s32.totalorder %s329_s21, %s329_s21 }
   0xb   :  { %p336_p6 = por %p335_p5, %p334_p4 }
   0xd   :  { %p337_p7 = pnand %p336_p6, %p330_p3 }
   0xf   :  { %340 = shalt.err (!%p337_p7)
}
  0x10   :  { %s368_s22 = smov 32   ;;  %s369_s23 = smov 2  }
  0x11   :  { %22 = dma.hbm_to_vmem [thread:$0]  %s487_s0, 256, %s17_s13, [#allocation7], %s368_s22, %s368_s22, %s369_s23  }
  0x12   :  { %363 = dma.done.wait [#allocation7], 256  }
  0x13   :  { %364 = vsyncadd [#allocation7], 4294967040  ;;  %vm37_vm0 = vcmask 254976   ;;  %v273_v0 = vld [vmem:[%s488_s1] ss:$0 sm:$0xff]  ;;  %vm34_vm1 = vcmask 1024   ;;  %v88_v30 = vstv %s489_s2 }
  0x14   :  { %v409_v1 = vld [vmem:[#allocation6 + $0x4] sm:$0x3]  ;;  %v411_v2 = vld [vmem:[#allocation6] sm:$0x3]  ;;  %v415_v5 = vld [vmem:[#allocation6 + $0x6] sm:$0x3] }
  0x15   :  { %v57_v3 = vmul.f32 %v273_v0, %v409_v1  ;;  %v55_v4 = vmul.f32 %v273_v0, %v411_v2  ;;  %v417_v6 = vld [vmem:[#allocation6 + $0x2] sm:$0x3]  ;;  %v58_v7 = vmul.f32 %v273_v0, %v415_v5  ;;  %v421_v9 = vld [vmem:[#allocation6 + $0xa] sm:$0x3]  ;;  %v423_v10 = vld [vmem:[#allocation6 + $0x8] sm:$0x3] }
  0x16   :  { %v56_v8 = vmul.f32 %v273_v0, %v417_v6  ;;  %v60_v15 = vmul.f32 %v273_v0, %v421_v9  ;;  %v59_v16 = vmul.f32 %v273_v0, %v423_v10  ;;  %v431_v17 = vld [vmem:[#allocation6 + $0xe] sm:$0x3]  ;;  %v433_v18 = vld [vmem:[#allocation6 + $0xc] sm:$0x3]  ;;  %v370_v25 = vmov -1e+30  }
  0x17   :  { %v70_v11 = vsel %vm37_vm0, %v57_v3, 0.0  ;;  %v64_v12 = vsel %vm37_vm0, %v55_v4, 0.0  ;;  %v73_v13 = vsel %vm37_vm0, %v58_v7, 0.0  ;;  %v62_v21 = vmul.f32 %v273_v0, %v431_v17  ;;  %35 = vst.msk [vmem:[#allocation2] sm:$0x3] %vm34_vm1, %v370_v25  ;;  %s373_s2 = smov [#allocation9]  }
  0x18   :  { %71 = vadd.xlane.f32.xlu1 %v70_v11  ;;  %65 = vadd.xlane.f32.xlu0 %v64_v12  ;;  %v67_v14 = vsel %vm37_vm0, %v56_v8, 0.0  ;;  %v79_v19 = vsel %vm37_vm0, %v60_v15, 0.0  ;;  %v76_v20 = vsel %vm37_vm0, %v59_v16, 0.0  ;;  %v61_v22 = vmul.f32 %v273_v0, %v433_v18  ;;  %s264_s28 = sshll.u32 %s373_s2, 4  ;;  %s265_s28 = int_to_ptr.vmem [resolvable:$true] %s264_s28 }
  0x19   :  { %v85_v23 = vsel %vm37_vm0, %v62_v21, 0.0  ;;  %v371_v26 = vmov 0.0   ;;  %v372_v27 = vmov 0   ;;  %vm106_vm2 = vcmask 1041408   ;;  %s341_s29 = scalar_lea.vmem %s265_s28, 32  ;;  %p346_p9 = scmp.lt.s32.totalorder %s265_s28, %s265_s28 }
  0x1a   :  { %v82_v24 = vsel %vm37_vm0, %v61_v22, 0.0  ;;  %36 = vst.msk [vmem:[#allocation3] sm:$0x3] %vm34_vm1, %v371_v26  ;;  %282 = vset.pattern.permute.xlu1 %v372_v27  ;;  %281 = vset.pattern.permute.xlu0 %v372_v27  ;;  %p342_p8 = scmp.ne.s32.totalorder %s265_s28, %s341_s29  ;;  %p347_p10 = scmp.lt.s32.totalorder %s341_s29, %s341_s29 }
  0x1b   :  { %38 = vst.msk [vmem:[#allocation4] sm:$0x3] %vm37_vm0, %v371_v26 }
  0x1c   :  { %74 = vadd.xlane.f32.xlu1 %v73_v13  ;;  %68 = vadd.xlane.f32.xlu0 %v67_v14  ;;  %p348_p11 = por %p347_p10, %p346_p9 }
  0x1e   :  { %v105_v7 = vld [vmem:[#allocation2] sm:$0x3]  ;;  %p349_p12 = pnand %p348_p11, %p342_p8 }
  0x20   :  { %80 = vadd.xlane.f32.xlu1 %v79_v19  ;;  %77 = vadd.xlane.f32.xlu0 %v76_v20 }
  0x24   :  { %86 = vadd.xlane.f32.xlu1 %v85_v23  ;;  %83 = vadd.xlane.f32.xlu0 %v82_v24 }
  0xa5   :  { %v72_v28 = vpop.xlane.xlu1 %71  ;;  %v66_v29 = vpop.xlane.xlu0 %65 }
  0xa6   :  { %v89_v33 = vadd.f32 %v88_v30, %v66_v29  ;;  %v91_v40 = vadd.f32 %v88_v30, %v72_v28 }
  0xa8   :  { %283 = vtanh.f32 %v89_v33 }
  0xa9   :  { %v75_v31 = vpop.xlane.xlu1 %74  ;;  %v69_v32 = vpop.xlane.xlu0 %68 }
  0xaa   :  { %v90_v34 = vadd.f32 %v88_v30, %v69_v32  ;;  %v92_v37 = vadd.f32 %v88_v30, %v75_v31 }
  0xac   :  { %285 = vtanh.f32 %v90_v34 }
  0xad   :  { %v81_v35 = vpop.xlane.xlu1 %80  ;;  %v78_v36 = vpop.xlane.xlu0 %77 }
  0xae   :  { %v94_v38 = vadd.f32 %v88_v30, %v81_v35  ;;  %v93_v39 = vadd.f32 %v88_v30, %v78_v36 }
  0xb0   :  { %287 = vtanh.f32 %v94_v38 }
  0xb1   :  { %289 = vtanh.f32 %v93_v39  ;;  %v87_v41 = vpop.xlane.xlu1 %86  ;;  %v84_v42 = vpop.xlane.xlu0 %83 }
  0xb2   :  { %291 = vtanh.f32 %v92_v37  ;;  %v96_v43 = vadd.f32 %v88_v30, %v87_v41  ;;  %v95_v44 = vadd.f32 %v88_v30, %v84_v42  ;;  %v284_v45 = vpop.eup %283 }
  0xb3   :  { %293 = vtanh.f32 %v91_v40  ;;  %v107_v54 = vsel %vm106_vm2, %v284_v45, -inf }
  0xb4   :  { %295 = vtanh.f32 %v96_v43 }
  0xb5   :  { %297 = vtanh.f32 %v95_v44 }
  0xb6   :  { %v286_v46 = vpop.eup %285 }
  0xb7   :  { %v108_v55 = vsel %vm106_vm2, %v286_v46, -inf }
  0xba   :  { %v288_v47 = vpop.eup %287 }
  0xbb   :  { %v290_v48 = vpop.eup %289  ;;  %v113_v50 = vsel %vm106_vm2, %v288_v47, -inf }
  0xbc   :  { %v292_v49 = vpop.eup %291  ;;  %v111_v51 = vsel %vm106_vm2, %v290_v48, -inf  ;;  %v114_v58 = vmax.f32 %v108_v55, %v113_v50 }
  0xbd   :  { %v294_v52 = vpop.eup %293  ;;  %v110_v57 = vsel %vm106_vm2, %v292_v49, -inf  ;;  %v112_v59 = vmax.f32 %v107_v54, %v111_v51 }
  0xbe   :  { %v296_v53 = vpop.eup %295  ;;  %v109_v61 = vsel %vm106_vm2, %v294_v52, -inf }
  0xbf   :  { %v298_v56 = vpop.eup %297  ;;  %v117_v60 = vsel %vm106_vm2, %v296_v53, -inf  ;;  %v119_v3 = vmax.f32 %v112_v59, %v114_v58 }
  0xc0   :  { %v118_v62 = vmax.f32 %v110_v57, %v117_v60  ;;  %v115_v63 = vsel %vm106_vm2, %v298_v56, -inf }
  0xc1   :  { %v116_v0 = vmax.f32 %v109_v61, %v115_v63 }
  0xc3   :  { %v120_v4 = vmax.f32 %v116_v0, %v118_v62 }
  0xc5   :  { %v121_v8 = vmax.f32 %v119_v3, %v120_v4 }
  0xc7   :  { %v122_v11 = vmax.f32 %v105_v7, %v121_v8 }
  0xc9   :  { %170 = vst.msk [vmem:[#allocation2] sm:$0x3] %vm34_vm1, %v122_v11  ;;  %v127_v12 = vsub.f32 %v286_v46, %v122_v11  ;;  %v126_v13 = vsub.f32 %v284_v45, %v122_v11  ;;  %v128_v14 = vsub.f32 %v294_v52, %v122_v11  ;;  %v129_v15 = vsub.f32 %v292_v49, %v122_v11  ;;  %v150_v52 = vld [vmem:[#allocation3] sm:$0x3] }
  0xca   :  { %v130_v20 = vsub.f32 %v290_v48, %v122_v11  ;;  %v131_v23 = vsub.f32 %v288_v47, %v122_v11  ;;  %v132_v24 = vsub.f32 %v298_v56, %v122_v11  ;;  %v133_v27 = vsub.f32 %v296_v53, %v122_v11 }
  0xcb   :  { %v136_v16 = vmul.f32 1.442695, %v127_v12  ;;  %v134_v19 = vmul.f32 1.442695, %v126_v13  ;;  %v138_v21 = vmul.f32 1.442695, %v128_v14  ;;  %v123_v28 = vsub.f32 %v105_v7, %v122_v11 }
  0xcc   :  { %v140_v22 = vmul.f32 1.442695, %v129_v15  ;;  %v142_v25 = vmul.f32 1.442695, %v130_v20  ;;  %v144_v26 = vmul.f32 1.442695, %v131_v23 }
  0xcd   :  { %299 = vpow2.f32 %v136_v16  ;;  %v146_v29 = vmul.f32 1.442695, %v132_v24  ;;  %v148_v30 = vmul.f32 1.442695, %v133_v27  ;;  %v124_v31 = vmul.f32 1.442695, %v123_v28 }
  0xce   :  { %301 = vpow2.f32 %v134_v19 }
  0xcf   :  { %303 = vpow2.f32 %v138_v21 }
  0xd0   :  { %305 = vpow2.f32 %v140_v22 }
  0xd1   :  { %307 = vpow2.f32 %v142_v25 }
  0xd2   :  { %309 = vpow2.f32 %v144_v26 }
  0xd3   :  { %311 = vpow2.f32 %v146_v29  ;;  %v171_v29 = vld [vmem:[#allocation4] sm:$0x3] }
  0xd4   :  { %313 = vpow2.f32 %v148_v30 }
  0xd5   :  { %315 = vpow2.f32 %v124_v31 }
  0xd7   :  { %v300_v32 = vpop.eup %299 }
  0xd8   :  { %v302_v33 = vpop.eup %301  ;;  %185 = vperm.xlu1 %282, %v300_v32   ;;  %v154_v34 = vsel %vm34_vm1, %v300_v32, 0.0 }
  0xd9   :  { %v304_v35 = vpop.eup %303  ;;  %180 = vperm.xlu0 %281, %v302_v33   ;;  %v153_v36 = vsel %vm34_vm1, %v302_v33, 0.0 }
  0xda   :  { %v306_v37 = vpop.eup %305  ;;  %v155_v38 = vadd.f32 %v154_v34, %v153_v36  ;;  %v156_v39 = vsel %vm34_vm1, %v304_v35, 0.0 }
  0xdb   :  { %v308_v40 = vpop.eup %307  ;;  %v158_v42 = vsel %vm34_vm1, %v306_v37, 0.0 }
  0xdc   :  { %190 = vperm.xlu1 %282, %v304_v35   ;;  %v157_v41 = vadd.f32 %v156_v39, %v155_v38  ;;  %v310_v43 = vpop.eup %309  ;;  %v160_v45 = vsel %vm34_vm1, %v308_v40, 0.0 }
  0xdd   :  { %v312_v46 = vpop.eup %311  ;;  %v162_v48 = vsel %vm34_vm1, %v310_v43, 0.0 }
  0xde   :  { %v159_v44 = vadd.f32 %v158_v42, %v157_v41  ;;  %v314_v49 = vpop.eup %313  ;;  %v164_v53 = vsel %vm34_vm1, %v312_v46, 0.0 }
  0xdf   :  { %v316_v51 = vpop.eup %315  ;;  %v166_v55 = vsel %vm34_vm1, %v314_v49, 0.0 }
  0xe0   :  { %195 = vperm.xlu1 %282, %v306_v37   ;;  %v161_v47 = vadd.f32 %v160_v45, %v159_v44  ;;  %v151_v56 = vmul.f32 %v316_v51, %v150_v52 }
  0xe2   :  { %v163_v50 = vadd.f32 %v162_v48, %v161_v47 }
  0xe4   :  { %200 = vperm.xlu1 %282, %v308_v40   ;;  %v165_v54 = vadd.f32 %v164_v53, %v163_v50 }
  0xe6   :  { %v167_v57 = vadd.f32 %v166_v55, %v165_v54 }
  0xe8   :  { %205 = vperm.xlu1 %282, %v310_v43   ;;  %v168_v58 = vadd.f32 %v167_v57, %v151_v56 }
  0xea   :  { %169 = vst.msk [vmem:[#allocation3] sm:$0x3] %vm34_vm1, %v168_v58 }
  0xec   :  { %210 = vperm.xlu1 %282, %v312_v46  }
  0xf0   :  { %215 = vperm.xlu1 %282, %v314_v49  }
  0xf1   :  { %v246_v59 = vld [vmem:[#allocation3] sm:$0x3] }
  0xf2   :  { %vm247_vm3 = vcmp.gt.f32.partialorder %v246_v59, 0.0 }
  0xf3   :  { %v248_v60 = vsel %vm247_vm3, %v246_v59, 1.0 }
  0xf4   :  { %252 = vperm.xlu0 %281, %v248_v60   ;;  %174 = vperm.xlu1 %282, %v316_v51  }
 0x157   :  { %v186_v61 = vpop.permute.xlu1 %185 }
 0x158   :  { %v181_v63 = vpop.permute.xlu0 %180  ;;  %v219_v3 = vmul.f32 %v186_v61, %v417_v6 }
 0x159   :  { %v218_v4 = vmul.f32 %v181_v63, %v411_v2 }
 0x15a   :  { %v227_v11 = vsel %vm37_vm0, %v219_v3, 0.0 }
 0x15b   :  { %v191_v62 = vpop.permute.xlu1 %190  ;;  %v226_v12 = vsel %vm37_vm0, %v218_v4, 0.0 }
 0x15c   :  { %v220_v7 = vmul.f32 %v191_v62, %v409_v1  ;;  %v228_v16 = vadd.f32 %v227_v11, %v226_v12 }
 0x15e   :  { %v229_v14 = vsel %vm37_vm0, %v220_v7, 0.0 }
 0x15f   :  { %v196_v0 = vpop.permute.xlu1 %195  ;;  %v230_v2 = vadd.f32 %v229_v14, %v228_v16 }
 0x160   :  { %v221_v13 = vmul.f32 %v196_v0, %v415_v5 }
 0x162   :  { %v231_v20 = vsel %vm37_vm0, %v221_v13, 0.0 }
 0x163   :  { %v201_v8 = vpop.permute.xlu1 %200  ;;  %v232_v21 = vadd.f32 %v231_v20, %v230_v2 }
 0x164   :  { %v222_v15 = vmul.f32 %v201_v8, %v423_v10 }
 0x166   :  { %v233_v1 = vsel %vm37_vm0, %v222_v15, 0.0 }
 0x167   :  { %v206_v19 = vpop.permute.xlu1 %205  ;;  %v234_v5 = vadd.f32 %v233_v1, %v232_v21 }
 0x168   :  { %v223_v6 = vmul.f32 %v206_v19, %v421_v9 }
 0x16a   :  { %v235_v23 = vsel %vm37_vm0, %v223_v6, 0.0 }
 0x16b   :  { %v211_v22 = vpop.permute.xlu1 %210  ;;  %v236_v26 = vadd.f32 %v235_v23, %v234_v5 }
 0x16c   :  { %v224_v24 = vmul.f32 %v211_v22, %v433_v18 }
 0x16e   :  { %v237_v25 = vsel %vm37_vm0, %v224_v24, 0.0 }
 0x16f   :  { %v216_v10 = vpop.permute.xlu1 %215  ;;  %v238_v28 = vadd.f32 %v237_v25, %v236_v26 }
 0x170   :  { %v225_v27 = vmul.f32 %v216_v10, %v431_v17 }
 0x172   :  { %v239_v9 = vsel %vm37_vm0, %v225_v27, 0.0 }
 0x173   :  { %v240_v30 = vadd.f32 %v239_v9, %v238_v28  ;;  %v253_v31 = vpop.permute.xlu0 %252  ;;  %v175_v32 = vpop.permute.xlu1 %174 }
 0x174   :  { %v177_v33 = vmul.f32 %v175_v32, %v171_v29  ;;  %317 = vrcp.f32 %v253_v31 }
 0x176   :  { %v241_v34 = vadd.f32 %v240_v30, %v177_v33 }
 0x178   :  { %242 = vst.msk [vmem:[#allocation4] sm:$0x3] %vm37_vm0, %v241_v34 }
 0x17e   :  { %v318_v18 = vpop.eup %317 }
 0x17f   :  { %v249_v35 = vld [vmem:[#allocation4] sm:$0x3] }
 0x180   :  { %v256_v36 = vmul.f32 %v318_v18, %v249_v35 }
 0x182   :  { %257 = vst.msk [vmem:[#allocation9] sm:$0x3] %vm37_vm0, %v256_v36 }
 0x183   :  { %352 = shalt.err (!%p349_p12)
}
 0x184   :  { %s353_s5 = scalar_lea.hbm %s490_s3, 32 }
 0x185   :  { %p354_p13 = scmp.ne.s32.totalorder %s490_s3, %s353_s5  ;;  %p357_p0 = scmp.lt.u32.totalorder %s353_s5, %s490_s3 }
 0x187   :  { %p359_p1 = pnand %p357_p0, %p354_p13 }
 0x189   :  { %362 = shalt.err (!%p359_p1)
}
 0x18a   :  { %267 = dma.vmem_to_hbm [thread:$0]  %s265_s28, 32, %s490_s3, [#allocation8]  }
 0x18b   :  { %365 = dma.done.wait [#allocation8], 32  }
 0x18c   :  { %366 = vsyncadd [#allocation8], 4294967264 }
 0x18d   :  { %271 = vsyncpa [#allocation7], 1 }
 0x18e   :  { %272 = vsyncpa [#allocation8], 1 }

</bundles_post_ra>
